<compile_context>
chip_gen: v5e
topology: v5e:2x2
jax: 0.10.0
libtpu: 0.0.40
codegen_flags: <defaults>
</compile_context>

<pallas_src>
import jax
import jax.numpy as jnp
from jax.experimental import pallas as pl
from jax.experimental.pallas import tpu as pltpu


def _round_up(v, m):
    return ((v + m - 1) // m) * m


def _fit_tile(total, target, quantum=128):
    """Largest multiple of `quantum` that divides `total` and is <= target."""
    best = quantum
    t = quantum
    limit = min(total, max(target, quantum))
    while t <= limit:
        if total % t == 0:
            best = t
        t += quantum
    return best


def _vmem_budget_bytes():
    """(tiling budget, vmem_limit_bytes) gated on the local TPU generation."""
    cap = None
    try:
        info = pltpu.get_tpu_info()
        for name in ("vmem_capacity_bytes", "vmem_bytes", "vmem_size_bytes"):
            cap = getattr(info, name, None)
            if cap:
                break
    except Exception:
        cap = None
    if not cap:
        cap = 64 * 1024 * 1024                       # conservative: v7x-sized
    if cap >= 100 * 1024 * 1024:                     # v5e / v6e: 128 MiB
        return 96 * 1024 * 1024, 112 * 1024 * 1024
    return 40 * 1024 * 1024, 48 * 1024 * 1024        # v7x: 64 MiB per TC


def _choose_tiles(N, E, C, budget, op_bytes, out_bytes):
    # --- contraction (K) axis -------------------------------------------
    if E <= 2048:
        tk, Ep = E, E
    else:
        Ep = _round_up(E, 128)
        tk = _fit_tile(Ep, 2048, 128)
    grid_k = Ep // tk

    # --- class axis -------------------------------------------------------
    Cp = _round_up(max(C, 128), 128)
    if tk * Cp * op_bytes <= budget // 3:            # weight comfortably resident
        tc = Cp
    else:
        tc = _fit_tile(Cp, 1024, 128)
    grid_c = Cp // tc

    # --- token axis -------------------------------------------------------
    w_bufs = 1 if (grid_k == 1 and grid_c == 1) else 2
    b_bufs = 1 if grid_c == 1 else 2
    fixed = w_bufs * tk * tc * op_bytes + b_bufs * tc * 4
    per_row = 2 * tk * op_bytes + 2 * tc * out_bytes + tc * 4   # x, out, f32 acc
    avail = max(budget - fixed, 8 * per_row)
    cap_rows = min(avail // per_row, 4096)
    if cap_rows >= 256:
        tn = (cap_rows // 256) * 256                 # full MXU passes (v6e/v7x)
    elif cap_rows >= 128:
        tn = 128
    else:
        tn = max(8, (cap_rows // 8) * 8)
    tn = min(tn, _round_up(N, 8))                    # don't exceed problem size
    # Keep >= 2 token tiles when possible so v7x's second TensorCore gets work.
    if N >= 512 and _round_up(N, tn) // tn < 2:
        tn = max(256, ((tn // 2) // 128) * 128)
    return tn, tc, tk, Ep, Cp


def _make_linear_call(*, Np, Ep, Cp, tn, tc, tk, op_dtype, out_dtype,
                      vmem_limit, use_buffered):
    grid = (Np // tn, Cp // tc, Ep // tk)

    def kernel(x_ref, w_ref, b_ref, o_ref, acc_ref):
        k = pl.program_id(2)

        @pl.when(k == 0)
        def _init():
            acc_ref[...] = jnp.zeros_like(acc_ref)

        # Canonical contraction: (tn, tk) @ (tk, tc) on the MXU, f32 accum.
        acc_ref[...] += jnp.dot(
            x_ref[...], w_ref[...], preferred_element_type=jnp.float32)

        @pl.when(k == pl.num_programs(2) - 1)
        def _store():
            o_ref[...] = (acc_ref[...] + b_ref[...]).astype(o_ref.dtype)

    # Resident operands (constant block index) -> single pipeline buffer.
    w_kwargs, b_kwargs = {}, {}
    if use_buffered and hasattr(pl, "Buffered"):
        if grid[1] == 1 and grid[2] == 1:
            w_kwargs["pipeline_mode"] = pl.Buffered(buffer_count=1)
        if grid[1] == 1:
            b_kwargs["pipeline_mode"] = pl.Buffered(buffer_count=1)

    cost = pl.CostEstimate(
        flops=2 * Np * Ep * Cp,
        transcendentals=0,
        bytes_accessed=(Np * Ep + Ep * Cp) * jnp.dtype(op_dtype).itemsize
        + Cp * 4 + Np * Cp * jnp.dtype(out_dtype).itemsize,
    )

    return pl.pallas_call(
        kernel,
        out_shape=jax.ShapeDtypeStruct((Np, Cp), out_dtype),
        grid=grid,
        in_specs=[
            pl.BlockSpec((tn, tk), lambda i, j, k: (i, k)),              # x tiles
            pl.BlockSpec((tk, tc), lambda i, j, k: (k, j), **w_kwargs),  # W^T tiles
            pl.BlockSpec((1, tc), lambda i, j, k: (0, j), **b_kwargs),   # bias
        ],
        out_specs=pl.BlockSpec((tn, tc), lambda i, j, k: (i, j)),
        scratch_shapes=[pltpu.VMEM((tn, tc), jnp.float32)],
        compiler_params=pltpu.CompilerParams(
            dimension_semantics=("parallel", "parallel", "arbitrary"),
            vmem_limit_bytes=vmem_limit,
        ),
        cost_estimate=cost,
    )


def token_classifier_forward(x, weight, bias, *, out_dtype=None,
                             use_bf16_operands=None):
    """Pallas equivalent of TokenClassifier.forward == nn.Linear(E, C).

    x:      (..., E)
    weight: (C, E)   (PyTorch layout)
    bias:   (C,)
    returns (..., C) in out_dtype (default: x.dtype)
    """
    *lead, E = x.shape
    C = weight.shape[0]
    out_dtype = x.dtype if out_dtype is None else jnp.dtype(out_dtype)

    x2d = x.reshape(-1, E)
    N = x2d.shape[0]

    # bf16 operands (f32 accumulation) once the head is big enough to be
    # MXU-bound; exact f32 path otherwise.
    if use_bf16_operands is None:
        use_bf16_operands = bool(x.dtype == jnp.float32 and E >= 1024 and C >= 1024)
    op_dtype = jnp.bfloat16 if use_bf16_operands else x2d.dtype

    budget, vmem_limit = _vmem_budget_bytes()
    op_bytes = jnp.dtype(op_dtype).itemsize
    out_bytes = jnp.dtype(out_dtype).itemsize
    tn, tc, tk, Ep, Cp = _choose_tiles(N, E, C, budget, op_bytes, out_bytes)
    Np = _round_up(max(N, tn), tn)

    # One-time layout prep in HBM (amortized over every token tile):
    #  * classes padded to Cp (multiple of 128) -> lane-dense output
    #  * weight pre-transposed to (E, Cp)       -> canonical MXU contraction
    #  * E / N padded only when the grid actually tiles those axes
    w_t = weight
    if Cp != C:
        w_t = jnp.pad(w_t, ((0, Cp - C), (0, 0)))
    w_t = w_t.T                                      # (E, Cp)
    if Ep != E:
        w_t = jnp.pad(w_t, ((0, Ep - E), (0, 0)))
        x2d = jnp.pad(x2d, ((0, 0), (0, Ep - E)))
    if Np != N:
        x2d = jnp.pad(x2d, ((0, Np - N), (0, 0)))
    b2d = bias
    if Cp != C:
        b2d = jnp.pad(b2d, (0, Cp - C))
    b2d = b2d.reshape(1, Cp).astype(jnp.float32)

    x2d = x2d.astype(op_dtype)
    w_t = w_t.astype(op_dtype)

    call_kwargs = dict(Np=Np, Ep=Ep, Cp=Cp, tn=tn, tc=tc, tk=tk,
                       op_dtype=op_dtype, out_dtype=out_dtype,
                       vmem_limit=vmem_limit)
    try:
        out = _make_linear_call(use_buffered=True, **call_kwargs)(x2d, w_t, b2d)
    except Exception:
        # Fallback for jax versions that reject single-buffer pipeline_mode.
        out = _make_linear_call(use_buffered=False, **call_kwargs)(x2d, w_t, b2d)

    if Np != N or Cp != C:
        # TODO(synk): for large vocab heads, fuse the consumer (softmax /
        # argmax / cross-entropy) into the kernel instead of materializing and
        # slicing the padded (Np, Cp) logits in HBM.
        out = out[:N, :C]
    return out.reshape(*lead, C)


if __name__ == "__main__":
    # Small shapes consistent with the forward: batch=2, seq=8, embedding=32,
    # num_classes=16.
    batch, seq, embedding_size, num_classes = 2, 8, 32, 16

    key = jax.random.PRNGKey(0)
    kx, kw, kb = jax.random.split(key, 3)

    x = jax.random.normal(kx, (batch, seq, embedding_size), dtype=jnp.float32)

    # Deterministic parameter init, same distribution family as nn.Linear:
    # uniform(-1/sqrt(E), 1/sqrt(E)) for both weight and bias.
    bound = 1.0 / jnp.sqrt(jnp.float32(embedding_size))
    weight = jax.random.uniform(
        kw, (num_classes, embedding_size), dtype=jnp.float32,
        minval=-bound, maxval=bound)
    bias = jax.random.uniform(
        kb, (num_classes,), dtype=jnp.float32, minval=-bound, maxval=bound)

    y = token_classifier_forward(x, weight, bias)
    jax.block_until_ready(y)

    # Reference check in plain JAX (same math as torch.nn.Linear).
    y_ref = jnp.einsum("bse,ce->bsc", x, weight) + bias
    assert y.shape == (batch, seq, num_classes)
    assert jnp.allclose(y, y_ref, atol=1e-5, rtol=1e-5)

    print("KERNEL_OK")
</pallas_src>

<mosaic_0001>
module attributes {stable_mosaic.version = 11 : i64} {
  func.func @kernel(%arg0: i32, %arg1: i32, %arg2: i32, %arg3: memref<16x32xf32, #tpu.memory_space<vmem>>, %arg4: memref<32x128xf32, #tpu.memory_space<vmem>>, %arg5: memref<1x128xf32, #tpu.memory_space<vmem>>, %arg6: memref<16x128xf32, #tpu.memory_space<vmem>>, %arg7: memref<16x128xf32, #tpu.memory_space<vmem>>) attributes {dimension_semantics = [#tpu.dimension_semantics<parallel>, #tpu.dimension_semantics<parallel>, #tpu.dimension_semantics<arbitrary>], iteration_bounds = array<i64: 1, 1, 1>, scalar_prefetch = 0 : i64, scratch_operands = 1 : i64, tpu.core_type = #tpu.core_type<tc>, window_params = [{transform_indices = @transform_0, window_bounds = array<i64: 16, 32>}, {pipeline_mode = #tpu.pipeline_mode<synchronous>, transform_indices = @transform_1, window_bounds = array<i64: 32, 128>}, {pipeline_mode = #tpu.pipeline_mode<synchronous>, transform_indices = @transform_2, window_bounds = array<i64: 1, 128>}, {transform_indices = @transform_3, window_bounds = array<i64: 16, 128>}]} {
    %c0_i32 = arith.constant 0 : i32
    %0 = arith.cmpi eq, %arg2, %c0_i32 : i32
    %1 = arith.extui %0 : i1 to i32
    %c0_i32_0 = arith.constant 0 : i32
    %2 = arith.cmpi ne, %1, %c0_i32_0 : i32
    scf.if %2 {
      %cst_10 = arith.constant 0.000000e+00 : f32
      %12 = vector.broadcast %cst_10 : f32 to vector<16x128xf32>
      %c0_11 = arith.constant 0 : index
      %c0_12 = arith.constant 0 : index
      %13 = vector.load %arg7[%c0_11, %c0_12] : memref<16x128xf32, #tpu.memory_space<vmem>>, vector<16x128xf32>
      tpu.vector_store %arg7[%c0_11, %c0_12], %12 {strides = array<i32>} : memref<16x128xf32, #tpu.memory_space<vmem>>, vector<16x128xf32>,
    } else {
    }
    %c0 = arith.constant 0 : index
    %c0_1 = arith.constant 0 : index
    %3 = vector.load %arg7[%c0, %c0_1] : memref<16x128xf32, #tpu.memory_space<vmem>>, vector<16x128xf32>
    %c0_2 = arith.constant 0 : index
    %c0_3 = arith.constant 0 : index
    %4 = vector.load %arg3[%c0_2, %c0_3] : memref<16x32xf32, #tpu.memory_space<vmem>>, vector<16x32xf32>
    %c0_4 = arith.constant 0 : index
    %c0_5 = arith.constant 0 : index
    %5 = vector.load %arg4[%c0_4, %c0_5] : memref<32x128xf32, #tpu.memory_space<vmem>>, vector<32x128xf32>
    %cst = arith.constant dense<0.000000e+00> : vector<16x128xf32>
    %6 = tpu.matmul %4, %5, %cst {dimension_numbers = #tpu.dot_dimension_numbers<[1], [0], [0], [1], [0, 0, 1, 1], [], []>} : vector<16x32xf32>, vector<32x128xf32>, vector<16x128xf32> -> vector<16x128xf32>
    %7 = arith.addf %3, %6 : vector<16x128xf32>
    %c0_6 = arith.constant 0 : index
    %c0_7 = arith.constant 0 : index
    %8 = vector.load %arg7[%c0_6, %c0_7] : memref<16x128xf32, #tpu.memory_space<vmem>>, vector<16x128xf32>
    tpu.vector_store %arg7[%c0_6, %c0_7], %7 {strides = array<i32>} : memref<16x128xf32, #tpu.memory_space<vmem>>, vector<16x128xf32>,
    %c0_i32_8 = arith.constant 0 : i32
    %9 = arith.cmpi eq, %arg2, %c0_i32_8 : i32
    %10 = arith.extui %9 : i1 to i32
    %c0_i32_9 = arith.constant 0 : i32
    %11 = arith.cmpi ne, %10, %c0_i32_9 : i32
    scf.if %11 {
      %c0_10 = arith.constant 0 : index
      %c0_11 = arith.constant 0 : index
      %12 = vector.load %arg7[%c0_10, %c0_11] : memref<16x128xf32, #tpu.memory_space<vmem>>, vector<16x128xf32>
      %c0_12 = arith.constant 0 : index
      %c0_13 = arith.constant 0 : index
      %13 = vector.load %arg5[%c0_12, %c0_13] : memref<1x128xf32, #tpu.memory_space<vmem>>, vector<1x128xf32>
      %14 = vector.broadcast %13 : vector<1x128xf32> to vector<16x128xf32>
      %15 = arith.addf %12, %14 : vector<16x128xf32>
      %c0_14 = arith.constant 0 : index
      %c0_15 = arith.constant 0 : index
      %16 = vector.load %arg6[%c0_14, %c0_15] : memref<16x128xf32, #tpu.memory_space<vmem>>, vector<16x128xf32>
      tpu.vector_store %arg6[%c0_14, %c0_15], %15 {strides = array<i32>} : memref<16x128xf32, #tpu.memory_space<vmem>>, vector<16x128xf32>,
    } else {
    }
    return
  }
  func.func @transform_0(%arg0: i32, %arg1: i32, %arg2: i32) -> (i32, i32) {
    %c0_i32 = arith.constant 0 : i32
    return %arg0, %arg2 : i32, i32
  }
  func.func @transform_1(%arg0: i32, %arg1: i32, %arg2: i32) -> (i32, i32) {
    %c0_i32 = arith.constant 0 : i32
    return %arg2, %arg1 : i32, i32
  }
  func.func @transform_2(%arg0: i32, %arg1: i32, %arg2: i32) -> (i32, i32) {
    %c0_i32 = arith.constant 0 : i32
    %c0_i32_0 = arith.constant 0 : i32
    return %c0_i32, %arg1 : i32, i32
  }
  func.func @transform_3(%arg0: i32, %arg1: i32, %arg2: i32) -> (i32, i32) {
    %c0_i32 = arith.constant 0 : i32
    return %arg0, %arg1 : i32, i32
  }
}

module attributes {stable_mosaic.version = 11 : i64} {
  func.func @kernel(%arg0: i32, %arg1: i32, %arg2: i32, %arg3: memref<16x32xf32, #tpu.memory_space<vmem>>, %arg4: memref<32x128xf32, #tpu.memory_space<vmem>>, %arg5: memref<1x128xf32, #tpu.memory_space<vmem>>, %arg6: memref<16x128xf32, #tpu.memory_space<vmem>>, %arg7: memref<16x128xf32, #tpu.memory_space<vmem>>) attributes {dimension_semantics = [#tpu.dimension_semantics<parallel>, #tpu.dimension_semantics<parallel>, #tpu.dimension_semantics<arbitrary>], iteration_bounds = array<i64: 1, 1, 1>, scalar_prefetch = 0 : i64, scratch_operands = 1 : i64, tpu.core_type = #tpu.core_type<tc>, window_params = [{transform_indices = @transform_0, window_bounds = array<i64: 16, 32>}, {transform_indices = @transform_1, window_bounds = array<i64: 32, 128>}, {transform_indices = @transform_2, window_bounds = array<i64: 1, 128>}, {transform_indices = @transform_3, window_bounds = array<i64: 16, 128>}]} {
    %c0_i32 = arith.constant 0 : i32
    %0 = arith.cmpi eq, %arg2, %c0_i32 : i32
    %1 = arith.extui %0 : i1 to i32
    %c0_i32_0 = arith.constant 0 : i32
    %2 = arith.cmpi ne, %1, %c0_i32_0 : i32
    scf.if %2 {
      %cst_10 = arith.constant 0.000000e+00 : f32
      %12 = vector.broadcast %cst_10 : f32 to vector<16x128xf32>
      %c0_11 = arith.constant 0 : index
      %c0_12 = arith.constant 0 : index
      %13 = vector.load %arg7[%c0_11, %c0_12] : memref<16x128xf32, #tpu.memory_space<vmem>>, vector<16x128xf32>
      tpu.vector_store %arg7[%c0_11, %c0_12], %12 {strides = array<i32>} : memref<16x128xf32, #tpu.memory_space<vmem>>, vector<16x128xf32>,
    } else {
    }
    %c0 = arith.constant 0 : index
    %c0_1 = arith.constant 0 : index
    %3 = vector.load %arg7[%c0, %c0_1] : memref<16x128xf32, #tpu.memory_space<vmem>>, vector<16x128xf32>
    %c0_2 = arith.constant 0 : index
    %c0_3 = arith.constant 0 : index
    %4 = vector.load %arg3[%c0_2, %c0_3] : memref<16x32xf32, #tpu.memory_space<vmem>>, vector<16x32xf32>
    %c0_4 = arith.constant 0 : index
    %c0_5 = arith.constant 0 : index
    %5 = vector.load %arg4[%c0_4, %c0_5] : memref<32x128xf32, #tpu.memory_space<vmem>>, vector<32x128xf32>
    %cst = arith.constant dense<0.000000e+00> : vector<16x128xf32>
    %6 = tpu.matmul %4, %5, %cst {dimension_numbers = #tpu.dot_dimension_numbers<[1], [0], [0], [1], [0, 0, 1, 1], [], []>} : vector<16x32xf32>, vector<32x128xf32>, vector<16x128xf32> -> vector<16x128xf32>
    %7 = arith.addf %3, %6 : vector<16x128xf32>
    %c0_6 = arith.constant 0 : index
    %c0_7 = arith.constant 0 : index
    %8 = vector.load %arg7[%c0_6, %c0_7] : memref<16x128xf32, #tpu.memory_space<vmem>>, vector<16x128xf32>
    tpu.vector_store %arg7[%c0_6, %c0_7], %7 {strides = array<i32>} : memref<16x128xf32, #tpu.memory_space<vmem>>, vector<16x128xf32>,
    %c0_i32_8 = arith.constant 0 : i32
    %9 = arith.cmpi eq, %arg2, %c0_i32_8 : i32
    %10 = arith.extui %9 : i1 to i32
    %c0_i32_9 = arith.constant 0 : i32
    %11 = arith.cmpi ne, %10, %c0_i32_9 : i32
    scf.if %11 {
      %c0_10 = arith.constant 0 : index
      %c0_11 = arith.constant 0 : index
      %12 = vector.load %arg7[%c0_10, %c0_11] : memref<16x128xf32, #tpu.memory_space<vmem>>, vector<16x128xf32>
      %c0_12 = arith.constant 0 : index
      %c0_13 = arith.constant 0 : index
      %13 = vector.load %arg5[%c0_12, %c0_13] : memref<1x128xf32, #tpu.memory_space<vmem>>, vector<1x128xf32>
      %14 = vector.broadcast %13 : vector<1x128xf32> to vector<16x128xf32>
      %15 = arith.addf %12, %14 : vector<16x128xf32>
      %c0_14 = arith.constant 0 : index
      %c0_15 = arith.constant 0 : index
      %16 = vector.load %arg6[%c0_14, %c0_15] : memref<16x128xf32, #tpu.memory_space<vmem>>, vector<16x128xf32>
      tpu.vector_store %arg6[%c0_14, %c0_15], %15 {strides = array<i32>} : memref<16x128xf32, #tpu.memory_space<vmem>>, vector<16x128xf32>,
    } else {
    }
    return
  }
  func.func @transform_0(%arg0: i32, %arg1: i32, %arg2: i32) -> (i32, i32) {
    %c0_i32 = arith.constant 0 : i32
    return %arg0, %arg2 : i32, i32
  }
  func.func @transform_1(%arg0: i32, %arg1: i32, %arg2: i32) -> (i32, i32) {
    %c0_i32 = arith.constant 0 : i32
    return %arg2, %arg1 : i32, i32
  }
  func.func @transform_2(%arg0: i32, %arg1: i32, %arg2: i32) -> (i32, i32) {
    %c0_i32 = arith.constant 0 : i32
    %c0_i32_0 = arith.constant 0 : i32
    return %c0_i32, %arg1 : i32, i32
  }
  func.func @transform_3(%arg0: i32, %arg1: i32, %arg2: i32) -> (i32, i32) {
    %c0_i32 = arith.constant 0 : i32
    return %arg0, %arg1 : i32, i32
  }
}

</mosaic_0001>

<bundles_post_ra>
// kernel: tpu_custom_call.1
= control target key start
LH: loop header
LB: loop body
LE: loop exit
PB: predicated region body
PF: predicated region fallthrough
CT: control target
= control target key end

     0   :  { %8 = vsyncpa [#allocation4], 0  ;;  %s264_s0 = inlined_call_operand.hbm [shape: f32[16,32], index: 0, kind: input, shape index: {}]   ;;  %s265_s1 = inlined_call_operand.hbm [shape: f32[32,128], index: 1, kind: input, shape index: {}]   ;;  %s266_s2 = inlined_call_operand.vmem [shape: f32[1,128], index: 2, kind: input, shape index: {}]   ;;  %s267_s3 = inlined_call_operand.hbm [shape: f32[16,128], index: 3, kind: output, shape index: {}]  }
   0x1   :  { %9 = vsyncpa [#allocation7], 0 }
   0x2   :  { %10 = vsyncpa [#allocation5], 0  ;;  %s15_s14 = sshll.u32 %s264_s0, 4  ;;  %s218_s15 = smov [#allocation3]   ;;  %s16_s14 = int_to_ptr.hbm [resolvable:$true] %s15_s14 }
   0x3   :  { %s17_s16 = sshll.u32 %s218_s15, 4  ;;  %s28_s19 = sshll.u32 %s265_s1, 4  ;;  %s18_s16 = int_to_ptr.vmem [resolvable:$true] %s17_s16  ;;  %s29_s19 = int_to_ptr.hbm [resolvable:$true] %s28_s19 }
   0x4   :  { %s219_s20 = smov 128   ;;  %s220_s21 = smov 8  }
   0x5   :  { %23 = dma.hbm_to_vmem [thread:$0]  %s16_s14, 256, %s18_s16, [#allocation4], %s219_s20, %s219_s20, %s220_s21  }
   0x6   :  { %s221_s22 = smov [#allocation6]  }
   0x7   :  { %s30_s23 = sshll.u32 %s221_s22, 4  ;;  %s31_s23 = int_to_ptr.vmem [resolvable:$true] %s30_s23 }
   0x8   :  { %36 = dma.hbm_to_vmem [thread:$0]  %s29_s19, 512, %s31_s23, [#allocation7], %s219_s20, %s219_s20, %s220_s21  }
   0x9   :  { %212 = dma.done.wait [#allocation4], 256  }
   0xa   :  { %213 = vsyncadd [#allocation4], 4294967040 }
   0xb   :  { %214 = dma.done.wait [#allocation7], 512  }
   0xc   :  { %215 = vsyncadd [#allocation7], 4294966784  ;;  %v60_v0 = vld [vmem:[#allocation6 + $0x18] sm:$0xff]  ;;  %v59_v1 = vld [vmem:[#allocation6 + $0x10] sm:$0xff]  ;;  %vm61_vm0 = vcmask 261120   ;;  %s222_s24 = smov [#allocation8]  }
   0xd   :  { %80 = vmatpush.msra.mxu0 %v60_v0  ;;  %130 = vmatpush.msra.mxu1 %v60_v0  ;;  %v58_v2 = vld [vmem:[#allocation6 + $0x8] sm:$0xff]  ;;  %v57_v3 = vld [vmem:[#allocation6] sm:$0xff]  ;;  %v55_v4 = vld [vmem:[#allocation3] sm:$0xff]  ;;  %s112_s25 = sshll.u32 %s222_s24, 4  ;;  %s114_s28 = sshll.u32 %s267_s3, 4  ;;  %s113_s25 = int_to_ptr.vmem [resolvable:$true] %s112_s25  ;;  %s115_s28 = int_to_ptr.hbm [resolvable:$true] %s114_s28 }
   0xe   :  { %v56_v5 = vld [vmem:[#allocation3 + $0x8] sm:$0xff]  ;;  %v139_v6 = vld [vmem:[%s266_s2] ss:$0 sm:$0xff] }
   0xf   :  { %81 = vmatpush.msra.mxu0 %v59_v1  ;;  %131 = vmatpush.msra.mxu1 %v59_v1 }
  0x11   :  { %82 = vmatpush.msra.mxu0 %v58_v2  ;;  %132 = vmatpush.msra.mxu1 %v58_v2 }
  0x13   :  { %83 = vmatpush.msra.mxu0 %v57_v3  ;;  %133 = vmatpush.msra.mxu1 %v57_v3 }
  0x14   :  { %128 = vmatmul.msk.f32.vlgmr.msra.gmra.mxu0 %vm61_vm0, %v55_v4  ;;  %129 = vmatmul.msk.f32.vlgmr.msra.gmra.mxu1 %vm61_vm0, %v56_v5 }
  0x91   :  { %v85_v7 = vpop.f32.mrf.mxu0  ;;  %v88_v8 = vpop.f32.mrf.mxu1 }
  0x92   :  { %v104_v9 = vadd.f32 %v139_v6, %v85_v7  ;;  %v105_v10 = vadd.f32 %v139_v6, %v88_v8 }
  0x94   :  { %106 = vst [vmem:[#allocation8] sm:$0xff] %v104_v9 }
  0x95   :  { %107 = vst [vmem:[#allocation8 + $0x8] sm:$0xff] %v105_v10 }
  0x96   :  { %120 = dma.vmem_to_hbm [thread:$0]  %s113_s25, 256, %s115_s28, [#allocation5], %s219_s20, %s219_s20, %s220_s21  }
  0x97   :  { %216 = dma.done.wait [#allocation5], 256  }
  0x98   :  { %217 = vsyncadd [#allocation5], 4294967040 }
  0x99   :  { %125 = vsyncpa [#allocation4], 1 }
  0x9a   :  { %126 = vsyncpa [#allocation7], 1 }
  0x9b   :  { %127 = vsyncpa [#allocation5], 1 }

// kernel: tpu_custom_call.1
= control target key start
LH: loop header
LB: loop body
LE: loop exit
PB: predicated region body
PF: predicated region fallthrough
CT: control target
= control target key end

     0   :  { %8 = vsyncpa [#allocation4], 0  ;;  %s264_s0 = inlined_call_operand.hbm [shape: f32[16,32], index: 0, kind: input, shape index: {}]   ;;  %s265_s1 = inlined_call_operand.hbm [shape: f32[32,128], index: 1, kind: input, shape index: {}]   ;;  %s266_s2 = inlined_call_operand.vmem [shape: f32[1,128], index: 2, kind: input, shape index: {}]   ;;  %s267_s3 = inlined_call_operand.hbm [shape: f32[16,128], index: 3, kind: output, shape index: {}]  }
   0x1   :  { %9 = vsyncpa [#allocation7], 0 }
   0x2   :  { %10 = vsyncpa [#allocation5], 0  ;;  %s15_s14 = sshll.u32 %s264_s0, 4  ;;  %s218_s15 = smov [#allocation3]   ;;  %s16_s14 = int_to_ptr.hbm [resolvable:$true] %s15_s14 }
   0x3   :  { %s17_s16 = sshll.u32 %s218_s15, 4  ;;  %s28_s19 = sshll.u32 %s265_s1, 4  ;;  %s18_s16 = int_to_ptr.vmem [resolvable:$true] %s17_s16  ;;  %s29_s19 = int_to_ptr.hbm [resolvable:$true] %s28_s19 }
   0x4   :  { %s219_s20 = smov 128   ;;  %s220_s21 = smov 8  }
   0x5   :  { %23 = dma.hbm_to_vmem [thread:$0]  %s16_s14, 256, %s18_s16, [#allocation4], %s219_s20, %s219_s20, %s220_s21  }
   0x6   :  { %s221_s22 = smov [#allocation6]  }
   0x7   :  { %s30_s23 = sshll.u32 %s221_s22, 4  ;;  %s31_s23 = int_to_ptr.vmem [resolvable:$true] %s30_s23 }
   0x8   :  { %36 = dma.hbm_to_vmem [thread:$0]  %s29_s19, 512, %s31_s23, [#allocation7], %s219_s20, %s219_s20, %s220_s21  }
   0x9   :  { %212 = dma.done.wait [#allocation4], 256  }
   0xa   :  { %213 = vsyncadd [#allocation4], 4294967040 }
   0xb   :  { %214 = dma.done.wait [#allocation7], 512  }
   0xc   :  { %215 = vsyncadd [#allocation7], 4294966784  ;;  %v60_v0 = vld [vmem:[#allocation6 + $0x18] sm:$0xff]  ;;  %v59_v1 = vld [vmem:[#allocation6 + $0x10] sm:$0xff]  ;;  %vm61_vm0 = vcmask 261120   ;;  %s222_s24 = smov [#allocation8]  }
   0xd   :  { %80 = vmatpush.msra.mxu0 %v60_v0  ;;  %130 = vmatpush.msra.mxu1 %v60_v0  ;;  %v58_v2 = vld [vmem:[#allocation6 + $0x8] sm:$0xff]  ;;  %v57_v3 = vld [vmem:[#allocation6] sm:$0xff]  ;;  %v55_v4 = vld [vmem:[#allocation3] sm:$0xff]  ;;  %s112_s25 = sshll.u32 %s222_s24, 4  ;;  %s114_s28 = sshll.u32 %s267_s3, 4  ;;  %s113_s25 = int_to_ptr.vmem [resolvable:$true] %s112_s25  ;;  %s115_s28 = int_to_ptr.hbm [resolvable:$true] %s114_s28 }
   0xe   :  { %v56_v5 = vld [vmem:[#allocation3 + $0x8] sm:$0xff]  ;;  %v139_v6 = vld [vmem:[%s266_s2] ss:$0 sm:$0xff] }
   0xf   :  { %81 = vmatpush.msra.mxu0 %v59_v1  ;;  %131 = vmatpush.msra.mxu1 %v59_v1 }
  0x11   :  { %82 = vmatpush.msra.mxu0 %v58_v2  ;;  %132 = vmatpush.msra.mxu1 %v58_v2 }
  0x13   :  { %83 = vmatpush.msra.mxu0 %v57_v3  ;;  %133 = vmatpush.msra.mxu1 %v57_v3 }
  0x14   :  { %128 = vmatmul.msk.f32.vlgmr.msra.gmra.mxu0 %vm61_vm0, %v55_v4  ;;  %129 = vmatmul.msk.f32.vlgmr.msra.gmra.mxu1 %vm61_vm0, %v56_v5 }
  0x91   :  { %v85_v7 = vpop.f32.mrf.mxu0  ;;  %v88_v8 = vpop.f32.mrf.mxu1 }
  0x92   :  { %v104_v9 = vadd.f32 %v139_v6, %v85_v7  ;;  %v105_v10 = vadd.f32 %v139_v6, %v88_v8 }
  0x94   :  { %106 = vst [vmem:[#allocation8] sm:$0xff] %v104_v9 }
  0x95   :  { %107 = vst [vmem:[#allocation8 + $0x8] sm:$0xff] %v105_v10 }
  0x96   :  { %120 = dma.vmem_to_hbm [thread:$0]  %s113_s25, 256, %s115_s28, [#allocation5], %s219_s20, %s219_s20, %s220_s21  }
  0x97   :  { %216 = dma.done.wait [#allocation5], 256  }
  0x98   :  { %217 = vsyncadd [#allocation5], 4294967040 }
  0x99   :  { %125 = vsyncpa [#allocation4], 1 }
  0x9a   :  { %126 = vsyncpa [#allocation7], 1 }
  0x9b   :  { %127 = vsyncpa [#allocation5], 1 }

</bundles_post_ra>
